<compile_context>
chip_gen: v5e
topology: v5e:2x2
jax: 0.10.0
libtpu: 0.0.40
codegen_flags: <defaults>
</compile_context>

<pallas_src>
import jax
import jax.numpy as jnp
from jax import lax
from jax.experimental import pallas as pl
from jax.experimental.pallas import tpu as pltpu


def fm_kernel(uid_ref, iid_ref, uf_ref, if_ref, out_ref):
    """One batch tile.

    uid_ref, iid_ref : (1, TB) int32 ids                         (VMEM)
    uf_ref           : (E+2, NU) f32 augmented user table        (VMEM, resident)
    if_ref           : (E+2, NI) f32 augmented item table        (VMEM, resident)
    out_ref          : (2, TB) f32 -> row 0 = pred, row 1 = ctr  (VMEM)
    """
    nu = uf_ref.shape[1]
    ni = if_ref.shape[1]
    tb = uid_ref.shape[1]

    uid = uid_ref[...]                                            # (1, TB)
    iid = iid_ref[...]                                            # (1, TB)

    # In-kernel gather as one-hot matmuls on the otherwise-idle MXU.
    u_oh = (lax.broadcasted_iota(jnp.int32, (nu, tb), 0) == uid).astype(jnp.float32)
    i_oh = (lax.broadcasted_iota(jnp.int32, (ni, tb), 0) == iid).astype(jnp.float32)

    u = jnp.dot(uf_ref[...], u_oh, preferred_element_type=jnp.float32)   # (E+2, TB)
    v = jnp.dot(if_ref[...], i_oh, preferred_element_type=jnp.float32)   # (E+2, TB)

    # Biases are folded into the two augmentation rows, so one sublane reduce
    # (XLU) produces the full prediction.
    pred = jnp.sum(u * v, axis=0, keepdims=True)                  # (1, TB)

    out_ref[0:1, :] = pred                                        # lane-dense store
    out_ref[1:2, :] = jax.nn.sigmoid(pred)                        # EUP transcendental


def _megacore():
    # Heuristic: parts that expose 2 TensorCores per JAX device.
    try:
        kind = jax.devices()[0].device_kind.lower()
    except Exception:
        return False
    return any(s in kind for s in ("v4", "v5p", "v7"))


def _pick_tile_b(b_pad, num_users, num_items, emb, two_cores):
    # Lane-dense candidates; target large (>= 0.5 MiB) blocks, bounded by a
    # conservative VMEM budget for the in-kernel one-hot intermediates.
    cands = [8192, 4096, 2048, 1024, 512, 256, 128]
    budget = 16 * 1024 * 1024

    def fits(c):
        # iota + one-hot for both vocabs + gathered operands + ids/outputs.
        inter = 4 * c * (2 * num_users + 2 * num_items + 2 * (emb + 2) + 8)
        return inter <= budget

    cands = [c for c in cands if b_pad % c == 0 and fits(c)]
    if not cands:
        return 128
    if two_cores:
        # Prefer the largest tile that still gives an even, >= 2 step grid so
        # dimension_semantics=("parallel",) keeps both TensorCores busy.
        for c in cands:
            steps = b_pad // c
            if steps >= 2 and steps % 2 == 0:
                return c
    # Single-TC parts (v5e/v6e): biggest tile wins; extra steps only add
    # ~0.35 us each and buy no overlap.
    return cands[0]


def fm_ehn_forward(user_id, item_id, user_factors, item_factors,
                   user_bias, item_bias, global_bias, *, tile_b=None):
    """Returns (pred, ctr), each of shape (B,) float32."""
    B = int(user_id.shape[0])
    num_users, E = user_factors.shape
    num_items = item_factors.shape[0]
    E_aug = E + 2

    # One-time (per parameter set, O(V*E) ~ KiB) table prep: transpose to
    # (E, V) and fold the three bias terms into two extra rows.
    uf_aug = jnp.concatenate(
        [user_factors.T.astype(jnp.float32),
         user_bias[None, :].astype(jnp.float32),
         jnp.ones((1, num_users), jnp.float32)], axis=0)                     # (E+2, NU)
    if_aug = jnp.concatenate(
        [item_factors.T.astype(jnp.float32),
         jnp.ones((1, num_items), jnp.float32),
         (item_bias + global_bias[0])[None, :].astype(jnp.float32)], axis=0)  # (E+2, NI)

    # Pad the batch to a lane-friendly size (ids padded with 0, a valid row);
    # the tail is sliced off after the call.
    B_pad = max(128, ((B + 127) // 128) * 128)
    if tile_b is None:
        tile_b = _pick_tile_b(B_pad, num_users, num_items, E, _megacore())
    assert B_pad % tile_b == 0 and tile_b % 128 == 0

    uid = jnp.pad(user_id.astype(jnp.int32)[None, :], ((0, 0), (0, B_pad - B)))
    iid = jnp.pad(item_id.astype(jnp.int32)[None, :], ((0, 0), (0, B_pad - B)))

    grid = (B_pad // tile_b,)
    out = pl.pallas_call(
        fm_kernel,
        out_shape=jax.ShapeDtypeStruct((2, B_pad), jnp.float32),
        grid_spec=pltpu.PrefetchScalarGridSpec(
            num_scalar_prefetch=0,
            grid=grid,
            in_specs=[
                pl.BlockSpec((1, tile_b), lambda i: (0, i)),            # user ids
                pl.BlockSpec((1, tile_b), lambda i: (0, i)),            # item ids
                pl.BlockSpec((E_aug, num_users), lambda i: (0, 0)),     # user table (resident)
                pl.BlockSpec((E_aug, num_items), lambda i: (0, 0)),     # item table (resident)
            ],
            out_specs=pl.BlockSpec((2, tile_b), lambda i: (0, i)),      # [pred; ctr]
        ),
        compiler_params=pltpu.CompilerParams(
            dimension_semantics=("parallel",)),
    )(uid, iid, uf_aug, if_aug)

    return out[0, :B], out[1, :B]


def reference_forward(user_id, item_id, user_factors, item_factors,
                      user_bias, item_bias, global_bias):
    u = jnp.take(user_factors, user_id, axis=0)
    v = jnp.take(item_factors, item_id, axis=0)
    pred = jnp.sum(u * v, axis=1)
    pred = pred + user_bias[user_id] + item_bias[item_id] + global_bias[0]
    return pred, jax.nn.sigmoid(pred)


if __name__ == "__main__":
    # Deterministic "module init": num_user=64, num_item=128, embedding_size=32.
    num_users, num_items, emb_size = 64, 128, 32

    key = jax.random.PRNGKey(0)
    k_uf, k_if, k_ub, k_ib, k_gb, k_u, k_i = jax.random.split(key, 7)

    user_factors = 0.3 * jax.random.normal(k_uf, (num_users, emb_size), jnp.float32)
    item_factors = 0.3 * jax.random.normal(k_if, (num_items, emb_size), jnp.float32)
    user_bias = jax.random.normal(k_ub, (num_users,), jnp.float32)
    item_bias = jax.random.normal(k_ib, (num_items,), jnp.float32)
    global_bias = jax.random.normal(k_gb, (1,), jnp.float32)

    for batch in (256, 53):   # 53 exercises the pad-and-slice path
        ku, ki = jax.random.split(jax.random.fold_in(key, batch))
        user_id = jax.random.randint(ku, (batch,), 0, num_users, jnp.int32)
        item_id = jax.random.randint(ki, (batch,), 0, num_items, jnp.int32)

        pred, ctr = fm_ehn_forward(user_id, item_id, user_factors, item_factors,
                                   user_bias, item_bias, global_bias)
        jax.block_until_ready((pred, ctr))

        pred_ref, ctr_ref = reference_forward(user_id, item_id, user_factors,
                                              item_factors, user_bias, item_bias,
                                              global_bias)
        assert pred.shape == (batch,) and ctr.shape == (batch,)
        assert jnp.allclose(pred, pred_ref, atol=1e-5, rtol=1e-5)
        assert jnp.allclose(ctr, ctr_ref, atol=1e-5, rtol=1e-5)

    print("KERNEL_OK")
</pallas_src>

<mosaic_0001>
module attributes {stable_mosaic.version = 11 : i64} {
  func.func @fm_kernel(%arg0: i32, %arg1: memref<1x256xi32, #tpu.memory_space<vmem>>, %arg2: memref<1x256xi32, #tpu.memory_space<vmem>>, %arg3: memref<34x64xf32, #tpu.memory_space<vmem>>, %arg4: memref<34x128xf32, #tpu.memory_space<vmem>>, %arg5: memref<2x256xf32, #tpu.memory_space<vmem>>) attributes {dimension_semantics = [#tpu.dimension_semantics<parallel>], iteration_bounds = array<i64: 1>, scalar_prefetch = 0 : i64, scratch_operands = 0 : i64, tpu.core_type = #tpu.core_type<tc>, window_params = [{transform_indices = @transform_0, window_bounds = array<i64: 1, 256>}, {transform_indices = @transform_1, window_bounds = array<i64: 1, 256>}, {pipeline_mode = #tpu.pipeline_mode<synchronous>, transform_indices = @transform_2, window_bounds = array<i64: 34, 64>}, {pipeline_mode = #tpu.pipeline_mode<synchronous>, transform_indices = @transform_3, window_bounds = array<i64: 34, 128>}, {transform_indices = @transform_4, window_bounds = array<i64: 2, 256>}]} {
    %c0 = arith.constant 0 : index
    %c0_0 = arith.constant 0 : index
    %0 = vector.load %arg1[%c0, %c0_0] : memref<1x256xi32, #tpu.memory_space<vmem>>, vector<1x256xi32>
    %c0_1 = arith.constant 0 : index
    %c0_2 = arith.constant 0 : index
    %1 = vector.load %arg2[%c0_1, %c0_2] : memref<1x256xi32, #tpu.memory_space<vmem>>, vector<1x256xi32>
    %2 = tpu.iota {dimensions = array<i32: 0>} : vector<64x256xi32>
    %3 = vector.broadcast %0 : vector<1x256xi32> to vector<64x256xi32>
    %4 = arith.cmpi eq, %2, %3 : vector<64x256xi32>
    %5 = arith.extui %4 : vector<64x256xi1> to vector<64x256xi32>
    %6 = arith.sitofp %5 : vector<64x256xi32> to vector<64x256xf32>
    %7 = tpu.iota {dimensions = array<i32: 0>} : vector<128x256xi32>
    %8 = vector.broadcast %1 : vector<1x256xi32> to vector<128x256xi32>
    %9 = arith.cmpi eq, %7, %8 : vector<128x256xi32>
    %10 = arith.extui %9 : vector<128x256xi1> to vector<128x256xi32>
    %11 = arith.sitofp %10 : vector<128x256xi32> to vector<128x256xf32>
    %c0_3 = arith.constant 0 : index
    %c0_4 = arith.constant 0 : index
    %12 = vector.load %arg3[%c0_3, %c0_4] : memref<34x64xf32, #tpu.memory_space<vmem>>, vector<34x64xf32>
    %cst = arith.constant dense<0.000000e+00> : vector<34x256xf32>
    %13 = tpu.matmul %12, %6, %cst {dimension_numbers = #tpu.dot_dimension_numbers<[1], [0], [0], [1], [0, 0, 1, 1], [], []>} : vector<34x64xf32>, vector<64x256xf32>, vector<34x256xf32> -> vector<34x256xf32>
    %c0_5 = arith.constant 0 : index
    %c0_6 = arith.constant 0 : index
    %14 = vector.load %arg4[%c0_5, %c0_6] : memref<34x128xf32, #tpu.memory_space<vmem>>, vector<34x128xf32>
    %cst_7 = arith.constant dense<0.000000e+00> : vector<34x256xf32>
    %15 = tpu.matmul %14, %11, %cst_7 {dimension_numbers = #tpu.dot_dimension_numbers<[1], [0], [0], [1], [0, 0, 1, 1], [], []>} : vector<34x128xf32>, vector<128x256xf32>, vector<34x256xf32> -> vector<34x256xf32>
    %16 = arith.mulf %13, %15 : vector<34x256xf32>
    %cst_8 = arith.constant dense<0.000000e+00> : vector<256xf32>
    %17 = vector.multi_reduction <add>, %16, %cst_8 [0] : vector<34x256xf32> to vector<256xf32>
    %18 = vector.shape_cast %17 : vector<256xf32> to vector<1x256xf32>
    %c0_9 = arith.constant 0 : index
    %c0_10 = arith.constant 0 : index
    %19 = vector.load %arg5[%c0_9, %c0_10] : memref<2x256xf32, #tpu.memory_space<vmem>>, vector<1x256xf32>
    tpu.vector_store %arg5[%c0_9, %c0_10], %18 {strides = array<i32>} : memref<2x256xf32, #tpu.memory_space<vmem>>, vector<1x256xf32>,
    %20 = arith.negf %18 : vector<1x256xf32>
    %21 = math.exp %20 : vector<1x256xf32>
    %cst_11 = arith.constant 1.000000e+00 : f32
    %22 = vector.broadcast %cst_11 : f32 to vector<1x256xf32>
    %23 = arith.addf %22, %21 : vector<1x256xf32>
    %24 = arith.divf %22, %23 : vector<1x256xf32>
    %c1 = arith.constant 1 : index
    %c0_12 = arith.constant 0 : index
    %25 = vector.load %arg5[%c1, %c0_12] : memref<2x256xf32, #tpu.memory_space<vmem>>, vector<1x256xf32>
    tpu.vector_store %arg5[%c1, %c0_12], %24 {strides = array<i32>} : memref<2x256xf32, #tpu.memory_space<vmem>>, vector<1x256xf32>,
    return
  }
  func.func @transform_0(%arg0: i32) -> (i32, i32) {
    %c0_i32 = arith.constant 0 : i32
    %c0_i32_0 = arith.constant 0 : i32
    return %c0_i32, %arg0 : i32, i32
  }
  func.func @transform_1(%arg0: i32) -> (i32, i32) {
    %c0_i32 = arith.constant 0 : i32
    %c0_i32_0 = arith.constant 0 : i32
    return %c0_i32, %arg0 : i32, i32
  }
  func.func @transform_2(%arg0: i32) -> (i32, i32) {
    %c0_i32 = arith.constant 0 : i32
    %c0_i32_0 = arith.constant 0 : i32
    %c0_i32_1 = arith.constant 0 : i32
    return %c0_i32, %c0_i32_0 : i32, i32
  }
  func.func @transform_3(%arg0: i32) -> (i32, i32) {
    %c0_i32 = arith.constant 0 : i32
    %c0_i32_0 = arith.constant 0 : i32
    %c0_i32_1 = arith.constant 0 : i32
    return %c0_i32, %c0_i32_0 : i32, i32
  }
  func.func @transform_4(%arg0: i32) -> (i32, i32) {
    %c0_i32 = arith.constant 0 : i32
    %c0_i32_0 = arith.constant 0 : i32
    return %c0_i32, %arg0 : i32, i32
  }
}

</mosaic_0001>

<bundles_post_ra>
// kernel: tpu_custom_call.1
= control target key start
LH: loop header
LB: loop body
LE: loop exit
PB: predicated region body
PF: predicated region fallthrough
CT: control target
= control target key end

     0   :  { %9 = vsyncpa [#allocation3], 0  ;;  %s1289_s0 = inlined_call_operand.hbm [shape: s32[1,256], index: 0, kind: input, shape index: {}]   ;;  %s1290_s1 = inlined_call_operand.hbm [shape: s32[1,256], index: 1, kind: input, shape index: {}]   ;;  %s1291_s2 = inlined_call_operand.hbm [shape: f32[34,64], index: 2, kind: input, shape index: {}]   ;;  %s1292_s3 = inlined_call_operand.hbm [shape: f32[34,128], index: 3, kind: input, shape index: {}]   ;;  %s1293_s4 = inlined_call_operand.hbm [shape: f32[2,256], index: 4, kind: output, shape index: {}]  }
   0x1   :  { %10 = vsyncpa [#allocation6], 0 }
   0x2   :  { %11 = vsyncpa [#allocation9], 0  ;;  %s29_s17 = sshll.u32 %s1290_s1, 4  ;;  %s30_s17 = int_to_ptr.hbm [resolvable:$true] %s29_s17 }
   0x3   :  { %12 = vsyncpa [#allocation4], 0  ;;  %s790_s18 = smov [#allocation5]   ;;  %s18_s22 = sshll.u32 %s1289_s0, 4  ;;  %s19_s22 = int_to_ptr.hbm [resolvable:$true] %s18_s22 }
   0x4   :  { %s31_s19 = sshll.u32 %s790_s18, 4  ;;  %s791_s23 = smov [#allocation2]   ;;  %s32_s19 = int_to_ptr.vmem [resolvable:$true] %s31_s19 }
   0x5   :  { %34 = dma.hbm_to_vmem [thread:$0]  %s30_s17, 32, %s32_s19, [#allocation6]  }
   0x6   :  { %s20_s24 = sshll.u32 %s791_s23, 4  ;;  %s39_s27 = sshll.u32 %s1291_s2, 4  ;;  %s21_s24 = int_to_ptr.vmem [resolvable:$true] %s20_s24  ;;  %s40_s27 = int_to_ptr.hbm [resolvable:$true] %s39_s27 }
   0x7   :  { %23 = dma.hbm_to_vmem [thread:$0]  %s19_s22, 32, %s21_s24, [#allocation3]  }
   0x8   :  { %s792_s1 = smov [#allocation7]   ;;  %s52_s5 = sshll.u32 %s1292_s3, 4  ;;  %s53_s5 = int_to_ptr.hbm [resolvable:$true] %s52_s5 }
   0x9   :  { %s41_s28 = sshll.u32 %s792_s1, 4  ;;  %s793_s6 = smov 128   ;;  %s42_s28 = int_to_ptr.vmem [resolvable:$true] %s41_s28 }
   0xa   :  { %s794_s0 = smov 8   ;;  %s795_s7 = smov [#allocation8]  }
   0xb   :  { %47 = dma.hbm_to_vmem [thread:$0]  %s40_s27, 640, %s42_s28, [#allocation6], %s793_s6, %s793_s6, %s794_s0  }
   0xc   :  { %s54_s8 = sshll.u32 %s795_s7, 4  ;;  %s55_s8 = int_to_ptr.vmem [resolvable:$true] %s54_s8 }
   0xd   :  { %60 = dma.hbm_to_vmem [thread:$0]  %s53_s5, 640, %s55_s8, [#allocation9], %s793_s6, %s793_s6, %s794_s0  }
   0xe   :  { %782 = dma.done.wait [#allocation3], 32  }
   0xf   :  { %783 = vsyncadd [#allocation3], 4294967264 }
  0x10   :  { %784 = dma.done.wait [#allocation6], 672  }
  0x11   :  { %785 = vsyncadd [#allocation6], 4294966624 }
  0x12   :  { %786 = dma.done.wait [#allocation9], 640  }
  0x13   :  { %787 = vsyncadd [#allocation9], 4294966656  ;;  %v79_v0 = vlaneseq  ;;  %v77_v5 = vld [vmem:[#allocation2] sm:$0x3]  ;;  %v78_v6 = vld [vmem:[#allocation5] sm:$0x3] }
  0x14   :  { %v853_v9 = vperm.slane %v77_v5, 0  ;;  %v855_v10 = vperm.slane %v77_v5, 1  ;;  %v857_v11 = vperm.slane %v78_v6, 0  ;;  %v859_v12 = vperm.slane %v78_v6, 1  ;;  %v244_v24 = vld [vmem:[#allocation7] sm:$0xff]  ;;  %v245_v25 = vld [vmem:[#allocation7 + $0x8] sm:$0xff] }
  0x15   :  { %v836_v1 = vshrl.u32 %v79_v0, 7  ;;  %v796_v15 = vmov 1.0   ;;  %v246_v26 = vld [vmem:[#allocation7 + $0x10] sm:$0xff]  ;;  %v247_v28 = vld [vmem:[#allocation7 + $0x18] sm:$0xff]  ;;  %v248_v30 = vld [vmem:[#allocation7 + $0x20] sm:$0x3] }
  0x16   :  { %v330_v27 = vld [vmem:[#allocation8 + $0x8] sm:$0xff]  ;;  %v331_v29 = vld [vmem:[#allocation8 + $0x10] sm:$0xff]  ;;  %v332_v31 = vld [vmem:[#allocation8 + $0x18] sm:$0xff]  ;;  %s797_s2 = smov [#allocation10]   ;;  %s494_s11 = sshll.u32 %s1293_s4, 4  ;;  %s495_s11 = int_to_ptr.hbm [resolvable:$true] %s494_s11 }
  0x17   :  { %v839_v2 = vadd.s32 56, %v836_v1  ;;  %v842_v3 = vadd.s32 120, %v836_v1  ;;  %v845_v4 = vadd.s32 48, %v836_v1  ;;  %v848_v7 = vadd.s32 112, %v836_v1  ;;  %v329_v32 = vld [vmem:[#allocation8] sm:$0xff]  ;;  %s492_s3 = sshll.u32 %s797_s2, 4  ;;  %s493_s3 = int_to_ptr.vmem [resolvable:$true] %s492_s3 }
  0x18   :  { %v851_v8 = vadd.s32 40, %v836_v1  ;;  %v862_v13 = vadd.s32 104, %v836_v1  ;;  %v865_v14 = vadd.s32 32, %v836_v1  ;;  %v884_v16 = vadd.s32 96, %v836_v1  ;;  %v333_v33 = vld [vmem:[#allocation8 + $0x20] sm:$0x3] }
  0x19   :  { %vm104_vm0 = vcmp.eq.s32.totalorder %v839_v2, %v853_v9  ;;  %vm105_vm1 = vcmp.eq.s32.totalorder %v839_v2, %v855_v10  ;;  %vm178_vm2 = vcmp.eq.s32.totalorder %v842_v3, %v857_v11  ;;  %vm179_vm3 = vcmp.eq.s32.totalorder %v842_v3, %v859_v12 }
  0x1a   :  { %554 = vmatpush.msk.msra.mxu0 %vm104_vm0, %v796_v15  ;;  %567 = vmatpush.msk.msra.mxu1 %vm105_vm1, %v796_v15  ;;  %vm102_vm4 = vcmp.eq.s32.totalorder %v845_v4, %v853_v9  ;;  %vm103_vm5 = vcmp.eq.s32.totalorder %v845_v4, %v855_v10  ;;  %vm176_vm6 = vcmp.eq.s32.totalorder %v848_v7, %v857_v11  ;;  %v901_v17 = vadd.s32 24, %v836_v1 }
  0x1b   :  { %614 = vmatpush.msk.msra.mxu2 %vm178_vm2, %v796_v15  ;;  %630 = vmatpush.msk.msra.mxu3 %vm179_vm3, %v796_v15  ;;  %vm177_vm7 = vcmp.eq.s32.totalorder %v848_v7, %v859_v12  ;;  %vm100_vm8 = vcmp.eq.s32.totalorder %v851_v8, %v853_v9  ;;  %vm101_vm9 = vcmp.eq.s32.totalorder %v851_v8, %v855_v10  ;;  %v910_v18 = vadd.s32 88, %v836_v1 }
  0x1c   :  { %555 = vmatpush.msk.msra.mxu0 %vm102_vm4, %v796_v15  ;;  %568 = vmatpush.msk.msra.mxu1 %vm103_vm5, %v796_v15  ;;  %vm174_vm10 = vcmp.eq.s32.totalorder %v862_v13, %v857_v11  ;;  %vm175_vm11 = vcmp.eq.s32.totalorder %v862_v13, %v859_v12  ;;  %vm98_vm12 = vcmp.eq.s32.totalorder %v865_v14, %v853_v9  ;;  %v925_v19 = vadd.s32 16, %v836_v1 }
  0x1d   :  { %615 = vmatpush.msk.msra.mxu2 %vm176_vm6, %v796_v15  ;;  %631 = vmatpush.msk.msra.mxu3 %vm177_vm7, %v796_v15  ;;  %vm99_vm13 = vcmp.eq.s32.totalorder %v865_v14, %v855_v10  ;;  %vm1294_vm14 = vcmp.eq.s32.totalorder %v884_v16, %v857_v11  ;;  %vm173_vm15 = vcmp.eq.s32.totalorder %v884_v16, %v859_v12  ;;  %v934_v20 = vadd.s32 80, %v836_v1 }
  0x1e   :  { %556 = vmatpush.msk.msra.mxu0 %vm100_vm8, %v796_v15  ;;  %569 = vmatpush.msk.msra.mxu1 %vm101_vm9, %v796_v15  ;;  %vm96_vm0 = vcmp.eq.s32.totalorder %v901_v17, %v853_v9  ;;  %vm97_vm1 = vcmp.eq.s32.totalorder %v901_v17, %v855_v10  ;;  %v949_v21 = vadd.s32 8, %v836_v1  ;;  %vm1295_vm4 = vcmp.eq.s32.totalorder %v910_v18, %v857_v11 }
  0x1f   :  { %616 = vmatpush.msk.msra.mxu2 %vm174_vm10, %v796_v15  ;;  %632 = vmatpush.msk.msra.mxu3 %vm175_vm11, %v796_v15  ;;  %vm1296_vm5 = vcmp.eq.s32.totalorder %v910_v18, %v859_v12  ;;  %v958_v22 = vadd.s32 72, %v836_v1  ;;  %vm94_vm8 = vcmp.eq.s32.totalorder %v925_v19, %v853_v9  ;;  %vm95_vm9 = vcmp.eq.s32.totalorder %v925_v19, %v855_v10 }
  0x20   :  { %557 = vmatpush.msk.msra.mxu0 %vm98_vm12, %v796_v15  ;;  %570 = vmatpush.msk.msra.mxu1 %vm99_vm13, %v796_v15  ;;  %vm1297_vm12 = vcmp.eq.s32.totalorder %v934_v20, %v857_v11  ;;  %vm169_vm13 = vcmp.eq.s32.totalorder %v934_v20, %v859_v12  ;;  %v979_v23 = vadd.s32 64, %v836_v1 }
  0x21   :  { %617 = vmatpush.msk.msra.mxu2 %vm1294_vm14, %v796_v15  ;;  %633 = vmatpush.msk.msra.mxu3 %vm173_vm15, %v796_v15  ;;  %vm1298_vm14 = vcmp.eq.s32.totalorder %v958_v22, %v857_v11 }
  0x22   :  { %558 = vmatpush.msk.msra.mxu0 %vm96_vm0, %v796_v15  ;;  %571 = vmatpush.msk.msra.mxu1 %vm97_vm1, %v796_v15  ;;  %vm92_vm0 = vcmp.eq.s32.totalorder %v949_v21, %v853_v9  ;;  %vm93_vm1 = vcmp.eq.s32.totalorder %v949_v21, %v855_v10 }
  0x23   :  { %618 = vmatpush.msk.msra.mxu2 %vm1295_vm4, %v796_v15  ;;  %634 = vmatpush.msk.msra.mxu3 %vm1296_vm5, %v796_v15  ;;  %vm167_vm4 = vcmp.eq.s32.totalorder %v958_v22, %v859_v12  ;;  %vm164_vm5 = vcmp.eq.s32.totalorder %v979_v23, %v857_v11 }
  0x24   :  { %559 = vmatpush.msk.msra.mxu0 %vm94_vm8, %v796_v15  ;;  %572 = vmatpush.msk.msra.mxu1 %vm95_vm9, %v796_v15  ;;  %vm90_vm8 = vcmp.eq.s32.totalorder %v836_v1, %v853_v9  ;;  %vm91_vm9 = vcmp.eq.s32.totalorder %v836_v1, %v855_v10 }
  0x25   :  { %619 = vmatpush.msk.msra.mxu2 %vm1297_vm12, %v796_v15  ;;  %635 = vmatpush.msk.msra.mxu3 %vm169_vm13, %v796_v15  ;;  %vm165_vm12 = vcmp.eq.s32.totalorder %v979_v23, %v859_v12 }
  0x26   :  { %560 = vmatpush.msk.msra.mxu0 %vm92_vm0, %v796_v15  ;;  %573 = vmatpush.msk.msra.mxu1 %vm93_vm1, %v796_v15  ;;  %vm249_vm0 = vcmask 523264   ;;  %vm1299_vm1 = vcmp.eq.s32.totalorder %v839_v2, %v857_v11 }
  0x27   :  { %620 = vmatpush.msk.msra.mxu2 %vm1298_vm14, %v796_v15  ;;  %636 = vmatpush.msk.msra.mxu3 %vm167_vm4, %v796_v15  ;;  %vm163_vm14 = vcmp.eq.s32.totalorder %v839_v2, %v859_v12 }
  0x28   :  { %561 = vmatpush.msk.msra.mxu0 %vm90_vm8, %v796_v15  ;;  %574 = vmatpush.msk.msra.mxu1 %vm91_vm9, %v796_v15  ;;  %vm160_vm8 = vcmp.eq.s32.totalorder %v845_v4, %v857_v11  ;;  %vm161_vm9 = vcmp.eq.s32.totalorder %v845_v4, %v859_v12 }
  0x29   :  { %621 = vmatpush.msk.msra.mxu2 %vm164_vm5, %v796_v15  ;;  %637 = vmatpush.msk.msra.mxu3 %vm165_vm12, %v796_v15 }
  0x2a   :  { %562 = vmatmul.msk.f32.vlgmr.msra.gmra.mxu0 %vm249_vm0, %v244_v24  ;;  %575 = vmatmul.msk.f32.vlgmr.msra.gmra.mxu1 %vm249_vm0, %v244_v24 }
  0x2b   :  { %622 = vmatpush.msk.msra.mxu2 %vm1299_vm1, %v796_v15  ;;  %596 = vmatpush.msk.msrb.mxu1 %vm179_vm3, %v796_v15  ;;  %vm158_vm1 = vcmp.eq.s32.totalorder %v851_v8, %v857_v11  ;;  %vm159_vm3 = vcmp.eq.s32.totalorder %v851_v8, %v859_v12 }
  0x2c   :  { %638 = vmatpush.msk.msra.mxu3 %vm163_vm14, %v796_v15  ;;  %580 = vmatpush.msk.msrb.mxu0 %vm178_vm2, %v796_v15  ;;  %vm1300_vm2 = vcmp.eq.s32.totalorder %v865_v14, %v857_v11 }
  0x2d   :  { %623 = vmatpush.msk.msra.mxu2 %vm160_vm8, %v796_v15  ;;  %597 = vmatpush.msk.msrb.mxu1 %vm177_vm7, %v796_v15  ;;  %vm1301_vm7 = vcmp.eq.s32.totalorder %v865_v14, %v859_v12 }
  0x2e   :  { %639 = vmatpush.msk.msra.mxu3 %vm161_vm9, %v796_v15  ;;  %581 = vmatpush.msk.msrb.mxu0 %vm176_vm6, %v796_v15  ;;  %vm1302_vm6 = vcmp.eq.s32.totalorder %v901_v17, %v857_v11 }
  0x2f   :  { %624 = vmatpush.msk.msra.mxu2 %vm158_vm1, %v796_v15  ;;  %598 = vmatpush.msk.msrb.mxu1 %vm175_vm11, %v796_v15  ;;  %vm1303_vm11 = vcmp.eq.s32.totalorder %v901_v17, %v859_v12 }
  0x30   :  { %640 = vmatpush.msk.msra.mxu3 %vm159_vm3, %v796_v15  ;;  %582 = vmatpush.msk.msrb.mxu0 %vm174_vm10, %v796_v15  ;;  %vm1304_vm10 = vcmp.eq.s32.totalorder %v925_v19, %v857_v11 }
  0x31   :  { %625 = vmatpush.msk.msra.mxu2 %vm1300_vm2, %v796_v15  ;;  %599 = vmatpush.msk.msrb.mxu1 %vm173_vm15, %v796_v15  ;;  %vm153_vm15 = vcmp.eq.s32.totalorder %v925_v19, %v859_v12  ;;  %vm1305_vm2 = vcmp.eq.s32.totalorder %v884_v16, %v857_v11 }
  0x32   :  { %641 = vmatpush.msk.msra.mxu3 %vm1301_vm7, %v796_v15  ;;  %563 = vmatmul.msk.f32.gmra.mxu0 %vm249_vm0, %v245_v25  ;;  %vm150_vm7 = vcmp.eq.s32.totalorder %v949_v21, %v857_v11 }
  0x33   :  { %576 = vmatmul.msk.f32.gmra.mxu1 %vm249_vm0, %v245_v25  ;;  %626 = vmatpush.msk.msra.mxu2 %vm1302_vm6, %v796_v15  ;;  %vm1306_vm6 = vcmp.eq.s32.totalorder %v910_v18, %v859_v12 }
  0x34   :  { %642 = vmatpush.msk.msra.mxu3 %vm1303_vm11, %v796_v15  ;;  %583 = vmatpush.msk.msrb.mxu0 %vm1305_vm2, %v796_v15  ;;  %vm151_vm11 = vcmp.eq.s32.totalorder %v949_v21, %v859_v12  ;;  %vm1307_vm2 = vcmp.eq.s32.totalorder %v910_v18, %v857_v11 }
  0x35   :  { %627 = vmatpush.msk.msra.mxu2 %vm1304_vm10, %v796_v15  ;;  %600 = vmatpush.msk.msrb.mxu1 %vm1306_vm6, %v796_v15  ;;  %vm148_vm10 = vcmp.eq.s32.totalorder %v836_v1, %v857_v11  ;;  %vm149_vm6 = vcmp.eq.s32.totalorder %v836_v1, %v859_v12 }
  0x36   :  { %643 = vmatpush.msk.msra.mxu3 %vm153_vm15, %v796_v15  ;;  %584 = vmatpush.msk.msrb.mxu0 %vm1307_vm2, %v796_v15  ;;  %vm1308_vm2 = vcmp.eq.s32.totalorder %v934_v20, %v857_v11 }
  0x37   :  { %628 = vmatpush.msk.msra.mxu2 %vm150_vm7, %v796_v15  ;;  %601 = vmatpush.msk.msrb.mxu1 %vm169_vm13, %v796_v15  ;;  %vm1309_vm13 = vcmp.eq.s32.totalorder %v958_v22, %v857_v11 }
  0x38   :  { %644 = vmatpush.msk.msra.mxu3 %vm151_vm11, %v796_v15  ;;  %585 = vmatpush.msk.msrb.mxu0 %vm1308_vm2, %v796_v15 }
  0x39   :  { %629 = vmatpush.msk.msra.mxu2 %vm148_vm10, %v796_v15  ;;  %602 = vmatpush.msk.msrb.mxu1 %vm167_vm4, %v796_v15  ;;  %vm1310_vm4 = vcmp.eq.s32.totalorder %v839_v2, %v857_v11 }
  0x3a   :  { %645 = vmatpush.msk.msra.mxu3 %vm149_vm6, %v796_v15  ;;  %564 = vmatmul.msk.f32.gmra.mxu0 %vm249_vm0, %v246_v26 }
  0x3b   :  { %577 = vmatmul.msk.f32.gmra.mxu1 %vm249_vm0, %v246_v26  ;;  %353 = vmatmul.f32.vlgmr.msra.gmra.mxu2 %v330_v27 }
  0x3c   :  { %385 = vmatmul.f32.vlgmr.msra.gmra.mxu3 %v330_v27  ;;  %586 = vmatpush.msk.msrb.mxu0 %vm1309_vm13, %v796_v15 }
  0x3d   :  { %603 = vmatpush.msk.msrb.mxu1 %vm165_vm12, %v796_v15  ;;  %vm1313_vm12 = vcmp.eq.s32.totalorder %v901_v17, %v859_v12 }
  0x3e   :  { %587 = vmatpush.msk.msrb.mxu0 %vm164_vm5, %v796_v15  ;;  %vm1312_vm5 = vcmp.eq.s32.totalorder %v865_v14, %v857_v11 }
  0x3f   :  { %604 = vmatpush.msk.msrb.mxu1 %vm163_vm14, %v796_v15  ;;  %vm1311_vm14 = vcmp.eq.s32.totalorder %v865_v14, %v859_v12 }
  0x40   :  { %588 = vmatpush.msk.msrb.mxu0 %vm1310_vm4, %v796_v15 }
  0x41   :  { %605 = vmatpush.msk.msrb.mxu1 %vm161_vm9, %v796_v15  ;;  %vm434_vm9 = vcmask 1040384  }
  0x42   :  { %565 = vmatmul.msk.f32.gmra.mxu0 %vm249_vm0, %v247_v28 }
  0x43   :  { %578 = vmatmul.msk.f32.gmra.mxu1 %vm249_vm0, %v247_v28  ;;  %356 = vmatmul.f32.gmra.mxu2 %v331_v29 }
  0x44   :  { %388 = vmatmul.f32.gmra.mxu3 %v331_v29  ;;  %589 = vmatpush.msk.msrb.mxu0 %vm160_vm8, %v796_v15  ;;  %vm1315_vm8 = vcmp.eq.s32.totalorder %v925_v19, %v857_v11 }
  0x45   :  { %606 = vmatpush.msk.msrb.mxu1 %vm159_vm3, %v796_v15  ;;  %vm1270_vm3 = vcmp.lt.s32.totalorder %v79_v0, 256 }
  0x46   :  { %590 = vmatpush.msk.msrb.mxu0 %vm158_vm1, %v796_v15  ;;  %vm1314_vm1 = vcmp.eq.s32.totalorder %v901_v17, %v857_v11 }
  0x47   :  { %607 = vmatpush.msk.msrb.mxu1 %vm1311_vm14, %v796_v15 }
  0x48   :  { %591 = vmatpush.msk.msrb.mxu0 %vm1312_vm5, %v796_v15 }
  0x49   :  { %608 = vmatpush.msk.msrb.mxu1 %vm1313_vm12, %v796_v15 }
  0x4a   :  { %566 = vmatmul.msk.f32.gmra.mxu0 %vm249_vm0, %v248_v30 }
  0x4b   :  { %579 = vmatmul.msk.f32.gmra.mxu1 %vm249_vm0, %v248_v30  ;;  %359 = vmatmul.f32.gmra.mxu2 %v332_v31  ;;  %vm411_vm0 = vcmask 1041408  }
  0x4c   :  { %391 = vmatmul.f32.gmra.mxu3 %v332_v31  ;;  %592 = vmatpush.msk.msrb.mxu0 %vm1314_vm1, %v796_v15 }
  0x4d   :  { %609 = vmatpush.msk.msrb.mxu1 %vm153_vm15, %v796_v15 }
  0x4e   :  { %593 = vmatpush.msk.msrb.mxu0 %vm1315_vm8, %v796_v15 }
  0x4f   :  { %610 = vmatpush.msk.msrb.mxu1 %vm151_vm11, %v796_v15 }
  0x50   :  { %594 = vmatpush.msk.msrb.mxu0 %vm150_vm7, %v796_v15 }
  0x51   :  { %611 = vmatpush.msk.msrb.mxu1 %vm149_vm6, %v796_v15 }
  0x52   :  { %595 = vmatpush.msk.msrb.mxu0 %vm148_vm10, %v796_v15 }
  0x53   :  { %350 = vmatmul.f32.vlgmr.msrb.gmra.mxu0 %v329_v32  ;;  %362 = vmatmul.f32.gmra.mxu2 %v333_v33 }
  0x54   :  { %382 = vmatmul.f32.vlgmr.msrb.gmra.mxu1 %v329_v32  ;;  %394 = vmatmul.f32.gmra.mxu3 %v333_v33 }
  0xa7   :  { %v282_v34 = vpop.f32.mrf.mxu0  ;;  %v314_v35 = vpop.f32.mrf.mxu1 }
  0xaf   :  { %v285_v36 = vpop.f32.mrf.mxu0 }
  0xb0   :  { %v317_v37 = vpop.f32.mrf.mxu1 }
  0xb7   :  { %v288_v38 = vpop.f32.mrf.mxu0 }
  0xb8   :  { %v320_v39 = vpop.f32.mrf.mxu1 }
  0xbe   :  { %v354_v40 = vpop.f32.mrf.mxu2 }
  0xbf   :  { %v386_v41 = vpop.f32.mrf.mxu3  ;;  %v291_v42 = vpop.f32.mrf.mxu0  ;;  %v400_v51 = vmul.f32 %v354_v40, %v285_v36 }
  0xc0   :  { %v323_v43 = vpop.f32.mrf.mxu1  ;;  %v401_v54 = vmul.f32 %v386_v41, %v317_v37 }
  0xc6   :  { %v357_v44 = vpop.f32.mrf.mxu2 }
  0xc7   :  { %v389_v45 = vpop.f32.mrf.mxu3  ;;  %v294_v46 = vpop.f32.mrf.mxu0  ;;  %v402_v56 = vmul.f32 %v357_v44, %v288_v38 }
  0xc8   :  { %v326_v47 = vpop.f32.mrf.mxu1  ;;  %v403_v58 = vmul.f32 %v389_v45, %v320_v39 }
  0xce   :  { %v360_v48 = vpop.f32.mrf.mxu2 }
  0xcf   :  { %v392_v49 = vpop.f32.mrf.mxu3  ;;  %v404_v60 = vmul.f32 %v360_v48, %v291_v42 }
  0xd0   :  { %v351_v50 = vpop.f32.mrf.mxu0  ;;  %v405_v62 = vmul.f32 %v392_v49, %v323_v43 }
  0xd1   :  { %v398_v52 = vmul.f32 %v351_v50, %v282_v34  ;;  %v383_v53 = vpop.f32.mrf.mxu1 }
  0xd2   :  { %v399_v55 = vmul.f32 %v383_v53, %v314_v35 }
  0xd3   :  { %v408_v57 = vadd.f32 %v400_v51, %v398_v52 }
  0xd4   :  { %v420_v59 = vadd.f32 %v401_v54, %v399_v55 }
  0xd5   :  { %v409_v61 = vadd.f32 %v408_v57, %v402_v56 }
  0xd6   :  { %v421_v63 = vadd.f32 %v420_v59, %v403_v58  ;;  %v363_v1 = vpop.f32.mrf.mxu2 }
  0xd7   :  { %v406_v2 = vmul.f32 %v363_v1, %v294_v46  ;;  %v410_v3 = vadd.f32 %v409_v61, %v404_v60  ;;  %v395_v4 = vpop.f32.mrf.mxu3 }
  0xd8   :  { %v407_v5 = vmul.f32 %v395_v4, %v326_v47  ;;  %v422_v6 = vadd.f32 %v421_v63, %v405_v62 }
  0xd9   :  { %v412_v7 = vsel %vm411_vm0, %v406_v2, 0.0 }
  0xda   :  { %v413_v8 = vadd.f32 %v412_v7, %v410_v3  ;;  %v423_v9 = vsel %vm411_vm0, %v407_v5, 0.0 }
  0xdb   :  { %v424_v10 = vadd.f32 %v423_v9, %v422_v6 }
  0xdc   :  { %v414_v11 = vrot.slane %v413_v8, 4 }
  0xdd   :  { %v425_v12 = vrot.slane %v424_v10, 4 }
  0xde   :  { %v415_v13 = vadd.f32 %v414_v11, %v413_v8 }
  0xdf   :  { %v426_v14 = vadd.f32 %v425_v12, %v424_v10 }
  0xe0   :  { %v416_v15 = vrot.slane %v415_v13, 2 }
  0xe1   :  { %v427_v16 = vrot.slane %v426_v14, 2 }
  0xe2   :  { %v417_v17 = vadd.f32 %v416_v15, %v415_v13 }
  0xe3   :  { %v428_v18 = vadd.f32 %v427_v16, %v426_v14 }
  0xe4   :  { %v418_v19 = vrot.slane %v417_v17, 1 }
  0xe5   :  { %v429_v20 = vrot.slane %v428_v18, 1 }
  0xe6   :  { %v419_v21 = vadd.f32 %v418_v19, %v417_v17 }
  0xe7   :  { %v430_v22 = vadd.f32 %v429_v20, %v428_v18 }
  0xe8   :  { %v612_v23 = vmul.f32 -1.442695, %v419_v21 }
  0xe9   :  { %v433_v24 = vrot.slane %v430_v22, 7  ;;  %v613_v25 = vmul.f32 -1.442695, %v430_v22 }
  0xea   :  { %654 = vpow2.f32 %v612_v23 }
  0xeb   :  { %656 = vpow2.f32 %v613_v25  ;;  %v435_v27 = vsel %vm434_vm9, %v419_v21, %v433_v24 }
  0xec   :  { %441 = vst.msk [vmem:[#allocation10] ss:$2 sm:$0x3] %vm1270_vm3, %v435_v27 }
  0xf0   :  { %v655_v28 = vpop.eup %654 }
  0xf1   :  { %v657_v29 = vpop.eup %656  ;;  %v448_v30 = vadd.f32 1.0, %v655_v28 }
  0xf2   :  { %v449_v31 = vadd.f32 1.0, %v657_v29 }
  0xf3   :  { %658 = vrcp.f32 %v448_v30  ;;  %vm455_vm10 = vweird.f32 %v448_v30  ;;  %v461_v42 = vand.u32 2147483648, %v448_v30  ;;  %v459_v44 = vand.u32 2147483647, %v448_v30 }
  0xf4   :  { %660 = vrcp.f32 %v449_v31  ;;  %v476_v38 = vand.u32 2147483648, %v449_v31  ;;  %v474_v40 = vand.u32 2147483647, %v449_v31  ;;  %vm470_vm6 = vweird.f32 %v449_v31 }
  0xf5   :  { %v462_v49 = vor.u32 1.1754944e-38, %v461_v42  ;;  %vm460_vm4 = vcmp.eq.f32.partialorder %v459_v44, 8.507059e+37 }
  0xf6   :  { %v477_v46 = vor.u32 1.1754944e-38, %v476_v38  ;;  %vm475_vm13 = vcmp.eq.f32.partialorder %v474_v40, 8.507059e+37 }
  0xf9   :  { %v659_v32 = vpop.eup %658 }
  0xfa   :  { %v661_v33 = vpop.eup %660  ;;  %v451_v34 = vmul.f32 %v659_v32, %v448_v30  ;;  %vm456_vm7 = vweird.f32 %v659_v32 }
  0xfb   :  { %v466_v0 = vmul.f32 %v661_v33, %v449_v31  ;;  %vm471_vm11 = vweird.f32 %v661_v33  ;;  %vm1277_vm15 = vmor %vm455_vm10, %vm456_vm7 }
  0xfc   :  { %v452_v35 = vsub.f32 1.0, %v451_v34  ;;  %vm472_vm2 = vmor %vm470_vm6, %vm471_vm11 }
  0xfd   :  { %v467_v36 = vsub.f32 1.0, %v466_v0 }
  0xfe   :  { %v453_v37 = vmul.f32 %v659_v32, %v452_v35 }
  0xff   :  { %v468_v39 = vmul.f32 %v661_v33, %v467_v36 }
 0x100   :  { %v454_v41 = vadd.f32 %v659_v32, %v453_v37 }
 0x101   :  { %v469_v45 = vadd.f32 %v661_v33, %v468_v39 }
 0x102   :  { %v458_v47 = vsel %vm1277_vm15, %v659_v32, %v454_v41 }
 0x103   :  { %v473_v48 = vsel %vm472_vm2, %v661_v33, %v469_v45  ;;  %v463_v52 = vsel %vm460_vm4, %v462_v49, %v458_v47 }
 0x104   :  { %v478_v50 = vsel %vm475_vm13, %v477_v46, %v473_v48 }
 0x105   :  { %v482_v51 = vrot.slane %v478_v50, 7 }
 0x107   :  { %v483_v53 = vsel %vm434_vm9, %v463_v52, %v482_v51 }
 0x108   :  { %486 = vst.msk [vmem:[#allocation10 + $0x1] ss:$2 sm:$0x3] %vm1270_vm3, %v483_v53 }
 0x109   :  { %497 = dma.vmem_to_hbm [thread:$0]  %s493_s3, 64, %s495_s11, [#allocation4]  }
 0x10a   :  { %788 = dma.done.wait [#allocation4], 64  }
 0x10b   :  { %789 = vsyncadd [#allocation4], 4294967232 }
 0x10c   :  { %502 = vsyncpa [#allocation3], 1 }
 0x10d   :  { %503 = vsyncpa [#allocation6], 1 }
 0x10e   :  { %504 = vsyncpa [#allocation9], 1 }
 0x10f   :  { %505 = vsyncpa [#allocation4], 1 }

</bundles_post_ra>
